<compile_context>
chip_gen: v6e
topology: v6e:2x2x1
jax: 0.10.0
libtpu: 0.0.40
codegen_flags: <defaults>
</compile_context>

<pallas_src>
import functools

import jax
import jax.numpy as jnp
from jax.experimental import pallas as pl
from jax.experimental.pallas import tpu as pltpu

LANE = 128


def _round_up(x, m):
    return (x + m - 1) // m * m


def _pad_to(a, rows, cols, dtype):
    r, c = a.shape
    return jnp.pad(a, ((0, rows - r), (0, cols - c))).astype(dtype)


def _device_flags():
    try:
        kind = jax.devices()[0].device_kind.lower()
    except Exception:
        kind = ""
    return ("v7" in kind), ("v5" in kind)


def _mosaic_params():
    return pltpu.CompilerParams(
        dimension_semantics=("parallel", "arbitrary"),
        vmem_limit_bytes=32 * 1024 * 1024,
    )


# ----------------------------------------------------------------------------
# Kernels
# ----------------------------------------------------------------------------
def _matmul_kernel(a_ref, b_ref, o_ref, acc_ref):
    """o = a @ b.  f32 accumulation in VMEM scratch, cast to o.dtype on last K."""
    k = pl.program_id(1)

    @pl.when(k == 0)
    def _():
        acc_ref[...] = jnp.zeros_like(acc_ref)

    acc_ref[...] += jnp.dot(a_ref[...], b_ref[...],
                            preferred_element_type=jnp.float32)

    @pl.when(k == pl.num_programs(1) - 1)
    def _():
        o_ref[...] = acc_ref[...].astype(o_ref.dtype)


def _agg1_fused_kernel(adj_ref, s1_ref, b1_ref, w2_ref, o_ref, acc_ref):
    """s2 = relu(adj @ s1 + b1) @ W2.

    Accumulates adj@s1 in f32 over the K axis; on the last K step applies
    bias + relu and the fused layer-2 support matmul, writing bf16 s2.
    """
    k = pl.program_id(1)

    @pl.when(k == 0)
    def _():
        acc_ref[...] = jnp.zeros_like(acc_ref)

    acc_ref[...] += jnp.dot(adj_ref[...], s1_ref[...],
                            preferred_element_type=jnp.float32)

    @pl.when(k == pl.num_programs(1) - 1)
    def _():
        h = jnp.maximum(acc_ref[...] + b1_ref[...], 0.0)  # relu(gc1 out), f32
        # TODO(synk): training-mode dropout on `h` not implemented (eval = identity).
        o_ref[...] = jnp.dot(h.astype(jnp.bfloat16), w2_ref[...],
                             preferred_element_type=jnp.float32).astype(o_ref.dtype)


def _agg2_logsoftmax_kernel(adj_ref, s2_ref, b2_ref, o_ref, *, nclass):
    """out = log_softmax(adj @ s2 + b2) over the first `nclass` lanes.

    Accumulates directly into the f32 output block (VMEM-resident across K).
    """
    k = pl.program_id(1)

    @pl.when(k == 0)
    def _():
        o_ref[...] = jnp.zeros_like(o_ref)

    o_ref[...] += jnp.dot(adj_ref[...], s2_ref[...],
                          preferred_element_type=jnp.float32)

    @pl.when(k == pl.num_programs(1) - 1)
    def _():
        y = o_ref[...] + b2_ref[...]
        lane = jax.lax.broadcasted_iota(jnp.int32, y.shape, dimension=1)
        y = jnp.where(lane < nclass, y, -jnp.inf)     # mask padded class lanes
        m = jnp.max(y, axis=-1, keepdims=True)
        s = y - m
        lse = jnp.log(jnp.sum(jnp.exp(s), axis=-1, keepdims=True))
        o_ref[...] = s - lse


# ----------------------------------------------------------------------------
# Wrappers
# ----------------------------------------------------------------------------
def _matmul(a_p, b_p, tm, tk, out_dtype):
    """a_p: (Mp, Kp), b_p: (Kp, W) — all dims tile-aligned.  Returns (Mp, W)."""
    Mp, Kp = a_p.shape
    W = b_p.shape[1]
    return pl.pallas_call(
        _matmul_kernel,
        out_shape=jax.ShapeDtypeStruct((Mp, W), out_dtype),
        grid_spec=pltpu.PrefetchScalarGridSpec(
            num_scalar_prefetch=0,
            grid=(Mp // tm, Kp // tk),
            in_specs=[pl.BlockSpec((tm, tk), lambda i, k: (i, k)),
                      pl.BlockSpec((tk, W), lambda i, k: (k, 0))],
            out_specs=pl.BlockSpec((tm, W), lambda i, k: (i, 0)),
            scratch_shapes=[pltpu.VMEM((tm, W), jnp.float32)],
        ),
        compiler_params=_mosaic_params(),
    )(a_p, b_p)


def gcn_forward(x, adj, w1, b1, w2, b2, *, compute_dtype=jnp.bfloat16):
    """GCN.forward: log_softmax(adj @ relu(adj @ x @ W1 + b1) @ W2 + b2, dim=1)."""
    N, nfeat = x.shape
    nhid = w1.shape[1]
    nclass = w2.shape[1]
    assert adj.shape == (N, N) and w1.shape[0] == nfeat and w2.shape[0] == nhid

    is_v7, is_v5 = _device_flags()
    t_want = 1024 if is_v5 else 2048          # v5e: lowest HBM BW + 16 MiB scoped default

    # Lane-dense hidden / class widths.
    HID = _round_up(nhid, LANE)
    NCL = _round_up(nclass, LANE)

    # Shared tiling for both adj aggregations: square adj padding, K tile T,
    # row tile tm (tm | T | P).
    T = min(t_want, _round_up(N, LANE))
    P = _round_up(N, T)
    tm = T
    if is_v7 and (P // T) % 2 == 1:
        tm = T // 2                            # even row-tile count -> both TCs busy

    # ---- one-time pads / casts (adj bf16 cast+pad done exactly once) --------
    adj_p = _pad_to(adj, P, P, compute_dtype)
    w2_p = _pad_to(w2, HID, NCL, compute_dtype)
    b1_p = _pad_to(b1.reshape(1, -1), 1, HID, jnp.float32)
    b2_p = _pad_to(b2.reshape(1, -1), 1, NCL, jnp.float32)

    # ---- layer-1 support: s1 = x @ W1  -> (P, HID) bf16, lane-dense ---------
    Kf = _round_up(nfeat, LANE)
    tk1 = Kf if Kf <= t_want else t_want
    if Kf % tk1:
        tk1 = LANE                             # x is tiny vs adj; fallback is fine
    x_p = _pad_to(x, P, Kf, compute_dtype)
    w1_p = _pad_to(w1, Kf, HID, compute_dtype)
    s1 = _matmul(x_p, w1_p, tm, tk1, compute_dtype)

    grid = (P // tm, P // T)

    # ---- layer-1 aggregation fused with layer-2 support ---------------------
    # s2 = relu(adj @ s1 + b1) @ W2            -> (P, NCL) bf16 (h1 never hits HBM)
    s2 = pl.pallas_call(
        _agg1_fused_kernel,
        out_shape=jax.ShapeDtypeStruct((P, NCL), compute_dtype),
        grid_spec=pltpu.PrefetchScalarGridSpec(
            num_scalar_prefetch=0,
            grid=grid,
            in_specs=[pl.BlockSpec((tm, T), lambda i, k: (i, k)),
                      pl.BlockSpec((T, HID), lambda i, k: (k, 0)),
                      pl.BlockSpec((1, HID), lambda i, k: (0, 0)),
                      pl.BlockSpec((HID, NCL), lambda i, k: (0, 0))],
            out_specs=pl.BlockSpec((tm, NCL), lambda i, k: (i, 0)),
            scratch_shapes=[pltpu.VMEM((tm, HID), jnp.float32)],
        ),
        compiler_params=_mosaic_params(),
    )(adj_p, s1, b1_p, w2_p)

    # ---- layer-2 aggregation + bias + log_softmax ----------------------------
    out_p = pl.pallas_call(
        functools.partial(_agg2_logsoftmax_kernel, nclass=nclass),
        out_shape=jax.ShapeDtypeStruct((P, NCL), jnp.float32),
        grid_spec=pltpu.PrefetchScalarGridSpec(
            num_scalar_prefetch=0,
            grid=grid,
            in_specs=[pl.BlockSpec((tm, T), lambda i, k: (i, k)),
                      pl.BlockSpec((T, NCL), lambda i, k: (k, 0)),
                      pl.BlockSpec((1, NCL), lambda i, k: (0, 0))],
            out_specs=pl.BlockSpec((tm, NCL), lambda i, k: (i, 0)),
        ),
        compiler_params=_mosaic_params(),
    )(adj_p, s2, b2_p)

    return out_p[:N, :nclass]


if __name__ == "__main__":
    N, nfeat, nhid, nclass = 128, 32, 32, 16

    key = jax.random.PRNGKey(0)
    kx, ka, kw1, kb1, kw2, kb2 = jax.random.split(key, 6)

    x = jax.random.normal(kx, (N, nfeat), dtype=jnp.float32)

    # Symmetric random adjacency with self-loops, row-normalized (typical GCN input).
    a = (jax.random.uniform(ka, (N, N)) < 0.1).astype(jnp.float32)
    a = jnp.minimum(a + a.T + jnp.eye(N, dtype=jnp.float32), 1.0)
    adj = a / jnp.sum(a, axis=1, keepdims=True)

    # Kipf-style uniform init: stdv = 1/sqrt(out_features); weight is (in, out).
    sd1 = 1.0 / (nhid ** 0.5)
    w1 = jax.random.uniform(kw1, (nfeat, nhid), minval=-sd1, maxval=sd1,
                            dtype=jnp.float32)
    b1 = jax.random.uniform(kb1, (nhid,), minval=-sd1, maxval=sd1,
                            dtype=jnp.float32)
    sd2 = 1.0 / (nclass ** 0.5)
    w2 = jax.random.uniform(kw2, (nhid, nclass), minval=-sd2, maxval=sd2,
                            dtype=jnp.float32)
    b2 = jax.random.uniform(kb2, (nclass,), minval=-sd2, maxval=sd2,
                            dtype=jnp.float32)

    fwd = jax.jit(gcn_forward)
    out = jax.block_until_ready(fwd(x, adj, w1, b1, w2, b2))
    assert out.shape == (N, nclass)

    # Reference in plain JAX with the same mixed precision
    # (bf16 MXU inputs / bf16 intermediates, f32 accumulation + epilogue math).
    def mm(p, q):
        return jnp.dot(p.astype(jnp.bfloat16), q.astype(jnp.bfloat16),
                       preferred_element_type=jnp.float32)

    s1r = mm(x, w1)
    hr = jnp.maximum(mm(adj, s1r) + b1, 0.0)
    s2r = mm(hr, w2)
    ref = jax.nn.log_softmax(mm(adj, s2r) + b2, axis=1)

    assert jnp.allclose(out, ref, atol=5e-3, rtol=5e-3), (
        float(jnp.max(jnp.abs(out - ref))))

    print("KERNEL_OK")
</pallas_src>

<mosaic_0001>
module attributes {stable_mosaic.version = 11 : i64} {
  func.func @_matmul_kernel(%arg0: i32, %arg1: i32, %arg2: memref<128x128xbf16, #tpu.memory_space<vmem>>, %arg3: memref<128x128xbf16, #tpu.memory_space<vmem>>, %arg4: memref<128x128xbf16, #tpu.memory_space<vmem>>, %arg5: memref<128x128xf32, #tpu.memory_space<vmem>>) attributes {dimension_semantics = [#tpu.dimension_semantics<parallel>, #tpu.dimension_semantics<arbitrary>], iteration_bounds = array<i64: 1, 1>, scalar_prefetch = 0 : i64, scratch_operands = 1 : i64, tpu.core_type = #tpu.core_type<tc>, window_params = [{transform_indices = @transform_0, window_bounds = array<i64: 128, 128>}, {transform_indices = @transform_1, window_bounds = array<i64: 128, 128>}, {transform_indices = @transform_2, window_bounds = array<i64: 128, 128>}]} {
    %c0_i32 = arith.constant 0 : i32
    %0 = arith.cmpi eq, %arg1, %c0_i32 : i32
    %1 = arith.extui %0 : i1 to i32
    %c0_i32_0 = arith.constant 0 : i32
    %2 = arith.cmpi ne, %1, %c0_i32_0 : i32
    scf.if %2 {
      %cst_10 = arith.constant 0.000000e+00 : f32
      %12 = vector.broadcast %cst_10 : f32 to vector<128x128xf32>
      %c0_11 = arith.constant 0 : index
      %c0_12 = arith.constant 0 : index
      %13 = vector.load %arg5[%c0_11, %c0_12] : memref<128x128xf32, #tpu.memory_space<vmem>>, vector<128x128xf32>
      tpu.vector_store %arg5[%c0_11, %c0_12], %12 {strides = array<i32>} : memref<128x128xf32, #tpu.memory_space<vmem>>, vector<128x128xf32>,
    } else {
    }
    %c0 = arith.constant 0 : index
    %c0_1 = arith.constant 0 : index
    %3 = vector.load %arg5[%c0, %c0_1] : memref<128x128xf32, #tpu.memory_space<vmem>>, vector<128x128xf32>
    %c0_2 = arith.constant 0 : index
    %c0_3 = arith.constant 0 : index
    %4 = vector.load %arg2[%c0_2, %c0_3] : memref<128x128xbf16, #tpu.memory_space<vmem>>, vector<128x128xbf16>
    %c0_4 = arith.constant 0 : index
    %c0_5 = arith.constant 0 : index
    %5 = vector.load %arg3[%c0_4, %c0_5] : memref<128x128xbf16, #tpu.memory_space<vmem>>, vector<128x128xbf16>
    %cst = arith.constant dense<0.000000e+00> : vector<128x128xf32>
    %6 = tpu.matmul %4, %5, %cst {dimension_numbers = #tpu.dot_dimension_numbers<[1], [0], [0], [1], [0, 0, 1, 1], [], []>} : vector<128x128xbf16>, vector<128x128xbf16>, vector<128x128xf32> -> vector<128x128xf32>
    %7 = arith.addf %3, %6 : vector<128x128xf32>
    %c0_6 = arith.constant 0 : index
    %c0_7 = arith.constant 0 : index
    %8 = vector.load %arg5[%c0_6, %c0_7] : memref<128x128xf32, #tpu.memory_space<vmem>>, vector<128x128xf32>
    tpu.vector_store %arg5[%c0_6, %c0_7], %7 {strides = array<i32>} : memref<128x128xf32, #tpu.memory_space<vmem>>, vector<128x128xf32>,
    %c0_i32_8 = arith.constant 0 : i32
    %9 = arith.cmpi eq, %arg1, %c0_i32_8 : i32
    %10 = arith.extui %9 : i1 to i32
    %c0_i32_9 = arith.constant 0 : i32
    %11 = arith.cmpi ne, %10, %c0_i32_9 : i32
    scf.if %11 {
      %c0_10 = arith.constant 0 : index
      %c0_11 = arith.constant 0 : index
      %12 = vector.load %arg5[%c0_10, %c0_11] : memref<128x128xf32, #tpu.memory_space<vmem>>, vector<128x128xf32>
      %13 = arith.truncf %12 : vector<128x128xf32> to vector<128x128xbf16>
      %c0_12 = arith.constant 0 : index
      %c0_13 = arith.constant 0 : index
      %14 = vector.load %arg4[%c0_12, %c0_13] : memref<128x128xbf16, #tpu.memory_space<vmem>>, vector<128x128xbf16>
      tpu.vector_store %arg4[%c0_12, %c0_13], %13 {strides = array<i32>} : memref<128x128xbf16, #tpu.memory_space<vmem>>, vector<128x128xbf16>,
    } else {
    }
    return
  }
  func.func @transform_0(%arg0: i32, %arg1: i32) -> (i32, i32) {
    %c0_i32 = arith.constant 0 : i32
    return %arg0, %arg1 : i32, i32
  }
  func.func @transform_1(%arg0: i32, %arg1: i32) -> (i32, i32) {
    %c0_i32 = arith.constant 0 : i32
    %c0_i32_0 = arith.constant 0 : i32
    return %arg1, %c0_i32 : i32, i32
  }
  func.func @transform_2(%arg0: i32, %arg1: i32) -> (i32, i32) {
    %c0_i32 = arith.constant 0 : i32
    %c0_i32_0 = arith.constant 0 : i32
    return %arg0, %c0_i32 : i32, i32
  }
}

module attributes {stable_mosaic.version = 11 : i64} {
  func.func @_agg1_fused_kernel(%arg0: i32, %arg1: i32, %arg2: memref<128x128xbf16, #tpu.memory_space<vmem>>, %arg3: memref<128x128xbf16, #tpu.memory_space<vmem>>, %arg4: memref<1x128xf32, #tpu.memory_space<vmem>>, %arg5: memref<128x128xbf16, #tpu.memory_space<vmem>>, %arg6: memref<128x128xbf16, #tpu.memory_space<vmem>>, %arg7: memref<128x128xf32, #tpu.memory_space<vmem>>) attributes {dimension_semantics = [#tpu.dimension_semantics<parallel>, #tpu.dimension_semantics<arbitrary>], iteration_bounds = array<i64: 1, 1>, scalar_prefetch = 0 : i64, scratch_operands = 1 : i64, tpu.core_type = #tpu.core_type<tc>, window_params = [{transform_indices = @transform_0, window_bounds = array<i64: 128, 128>}, {transform_indices = @transform_1, window_bounds = array<i64: 128, 128>}, {pipeline_mode = #tpu.pipeline_mode<synchronous>, transform_indices = @transform_2, window_bounds = array<i64: 1, 128>}, {pipeline_mode = #tpu.pipeline_mode<synchronous>, transform_indices = @transform_3, window_bounds = array<i64: 128, 128>}, {transform_indices = @transform_4, window_bounds = array<i64: 128, 128>}]} {
    %c0_i32 = arith.constant 0 : i32
    %0 = arith.cmpi eq, %arg1, %c0_i32 : i32
    %1 = arith.extui %0 : i1 to i32
    %c0_i32_0 = arith.constant 0 : i32
    %2 = arith.cmpi ne, %1, %c0_i32_0 : i32
    scf.if %2 {
      %cst_10 = arith.constant 0.000000e+00 : f32
      %12 = vector.broadcast %cst_10 : f32 to vector<128x128xf32>
      %c0_11 = arith.constant 0 : index
      %c0_12 = arith.constant 0 : index
      %13 = vector.load %arg7[%c0_11, %c0_12] : memref<128x128xf32, #tpu.memory_space<vmem>>, vector<128x128xf32>
      tpu.vector_store %arg7[%c0_11, %c0_12], %12 {strides = array<i32>} : memref<128x128xf32, #tpu.memory_space<vmem>>, vector<128x128xf32>,
    } else {
    }
    %c0 = arith.constant 0 : index
    %c0_1 = arith.constant 0 : index
    %3 = vector.load %arg7[%c0, %c0_1] : memref<128x128xf32, #tpu.memory_space<vmem>>, vector<128x128xf32>
    %c0_2 = arith.constant 0 : index
    %c0_3 = arith.constant 0 : index
    %4 = vector.load %arg2[%c0_2, %c0_3] : memref<128x128xbf16, #tpu.memory_space<vmem>>, vector<128x128xbf16>
    %c0_4 = arith.constant 0 : index
    %c0_5 = arith.constant 0 : index
    %5 = vector.load %arg3[%c0_4, %c0_5] : memref<128x128xbf16, #tpu.memory_space<vmem>>, vector<128x128xbf16>
    %cst = arith.constant dense<0.000000e+00> : vector<128x128xf32>
    %6 = tpu.matmul %4, %5, %cst {dimension_numbers = #tpu.dot_dimension_numbers<[1], [0], [0], [1], [0, 0, 1, 1], [], []>} : vector<128x128xbf16>, vector<128x128xbf16>, vector<128x128xf32> -> vector<128x128xf32>
    %7 = arith.addf %3, %6 : vector<128x128xf32>
    %c0_6 = arith.constant 0 : index
    %c0_7 = arith.constant 0 : index
    %8 = vector.load %arg7[%c0_6, %c0_7] : memref<128x128xf32, #tpu.memory_space<vmem>>, vector<128x128xf32>
    tpu.vector_store %arg7[%c0_6, %c0_7], %7 {strides = array<i32>} : memref<128x128xf32, #tpu.memory_space<vmem>>, vector<128x128xf32>,
    %c0_i32_8 = arith.constant 0 : i32
    %9 = arith.cmpi eq, %arg1, %c0_i32_8 : i32
    %10 = arith.extui %9 : i1 to i32
    %c0_i32_9 = arith.constant 0 : i32
    %11 = arith.cmpi ne, %10, %c0_i32_9 : i32
    scf.if %11 {
      %c0_10 = arith.constant 0 : index
      %c0_11 = arith.constant 0 : index
      %12 = vector.load %arg7[%c0_10, %c0_11] : memref<128x128xf32, #tpu.memory_space<vmem>>, vector<128x128xf32>
      %c0_12 = arith.constant 0 : index
      %c0_13 = arith.constant 0 : index
      %13 = vector.load %arg4[%c0_12, %c0_13] : memref<1x128xf32, #tpu.memory_space<vmem>>, vector<1x128xf32>
      %14 = vector.broadcast %13 : vector<1x128xf32> to vector<128x128xf32>
      %15 = arith.addf %12, %14 : vector<128x128xf32>
      %cst_14 = arith.constant 0.000000e+00 : f32
      %16 = vector.broadcast %cst_14 : f32 to vector<128x128xf32>
      %17 = arith.maximumf %15, %16 : vector<128x128xf32>
      %18 = arith.truncf %17 : vector<128x128xf32> to vector<128x128xbf16>
      %c0_15 = arith.constant 0 : index
      %c0_16 = arith.constant 0 : index
      %19 = vector.load %arg5[%c0_15, %c0_16] : memref<128x128xbf16, #tpu.memory_space<vmem>>, vector<128x128xbf16>
      %cst_17 = arith.constant dense<0.000000e+00> : vector<128x128xf32>
      %20 = tpu.matmul %18, %19, %cst_17 {dimension_numbers = #tpu.dot_dimension_numbers<[1], [0], [0], [1], [0, 0, 1, 1], [], []>} : vector<128x128xbf16>, vector<128x128xbf16>, vector<128x128xf32> -> vector<128x128xf32>
      %21 = arith.truncf %20 : vector<128x128xf32> to vector<128x128xbf16>
      %c0_18 = arith.constant 0 : index
      %c0_19 = arith.constant 0 : index
      %22 = vector.load %arg6[%c0_18, %c0_19] : memref<128x128xbf16, #tpu.memory_space<vmem>>, vector<128x128xbf16>
      tpu.vector_store %arg6[%c0_18, %c0_19], %21 {strides = array<i32>} : memref<128x128xbf16, #tpu.memory_space<vmem>>, vector<128x128xbf16>,
    } else {
    }
    return
  }
  func.func @transform_0(%arg0: i32, %arg1: i32) -> (i32, i32) {
    %c0_i32 = arith.constant 0 : i32
    return %arg0, %arg1 : i32, i32
  }
  func.func @transform_1(%arg0: i32, %arg1: i32) -> (i32, i32) {
    %c0_i32 = arith.constant 0 : i32
    %c0_i32_0 = arith.constant 0 : i32
    return %arg1, %c0_i32 : i32, i32
  }
  func.func @transform_2(%arg0: i32, %arg1: i32) -> (i32, i32) {
    %c0_i32 = arith.constant 0 : i32
    %c0_i32_0 = arith.constant 0 : i32
    %c0_i32_1 = arith.constant 0 : i32
    return %c0_i32, %c0_i32_0 : i32, i32
  }
  func.func @transform_3(%arg0: i32, %arg1: i32) -> (i32, i32) {
    %c0_i32 = arith.constant 0 : i32
    %c0_i32_0 = arith.constant 0 : i32
    %c0_i32_1 = arith.constant 0 : i32
    return %c0_i32, %c0_i32_0 : i32, i32
  }
  func.func @transform_4(%arg0: i32, %arg1: i32) -> (i32, i32) {
    %c0_i32 = arith.constant 0 : i32
    %c0_i32_0 = arith.constant 0 : i32
    return %arg0, %c0_i32 : i32, i32
  }
}

module attributes {stable_mosaic.version = 11 : i64} {
  func.func @_agg2_logsoftmax_kernel(%arg0: i32, %arg1: i32, %arg2: memref<128x128xbf16, #tpu.memory_space<vmem>>, %arg3: memref<128x128xbf16, #tpu.memory_space<vmem>>, %arg4: memref<1x128xf32, #tpu.memory_space<vmem>>, %arg5: memref<128x128xf32, #tpu.memory_space<vmem>>) attributes {dimension_semantics = [#tpu.dimension_semantics<parallel>, #tpu.dimension_semantics<arbitrary>], iteration_bounds = array<i64: 1, 1>, scalar_prefetch = 0 : i64, scratch_operands = 0 : i64, tpu.core_type = #tpu.core_type<tc>, window_params = [{transform_indices = @transform_0, window_bounds = array<i64: 128, 128>}, {transform_indices = @transform_1, window_bounds = array<i64: 128, 128>}, {pipeline_mode = #tpu.pipeline_mode<synchronous>, transform_indices = @transform_2, window_bounds = array<i64: 1, 128>}, {transform_indices = @transform_3, window_bounds = array<i64: 128, 128>}]} {
    %c0_i32 = arith.constant 0 : i32
    %0 = arith.cmpi eq, %arg1, %c0_i32 : i32
    %1 = arith.extui %0 : i1 to i32
    %c0_i32_0 = arith.constant 0 : i32
    %2 = arith.cmpi ne, %1, %c0_i32_0 : i32
    scf.if %2 {
      %cst_10 = arith.constant 0.000000e+00 : f32
      %12 = vector.broadcast %cst_10 : f32 to vector<128x128xf32>
      %c0_11 = arith.constant 0 : index
      %c0_12 = arith.constant 0 : index
      %13 = vector.load %arg5[%c0_11, %c0_12] : memref<128x128xf32, #tpu.memory_space<vmem>>, vector<128x128xf32>
      tpu.vector_store %arg5[%c0_11, %c0_12], %12 {strides = array<i32>} : memref<128x128xf32, #tpu.memory_space<vmem>>, vector<128x128xf32>,
    } else {
    }
    %c0 = arith.constant 0 : index
    %c0_1 = arith.constant 0 : index
    %3 = vector.load %arg5[%c0, %c0_1] : memref<128x128xf32, #tpu.memory_space<vmem>>, vector<128x128xf32>
    %c0_2 = arith.constant 0 : index
    %c0_3 = arith.constant 0 : index
    %4 = vector.load %arg2[%c0_2, %c0_3] : memref<128x128xbf16, #tpu.memory_space<vmem>>, vector<128x128xbf16>
    %c0_4 = arith.constant 0 : index
    %c0_5 = arith.constant 0 : index
    %5 = vector.load %arg3[%c0_4, %c0_5] : memref<128x128xbf16, #tpu.memory_space<vmem>>, vector<128x128xbf16>
    %cst = arith.constant dense<0.000000e+00> : vector<128x128xf32>
    %6 = tpu.matmul %4, %5, %cst {dimension_numbers = #tpu.dot_dimension_numbers<[1], [0], [0], [1], [0, 0, 1, 1], [], []>} : vector<128x128xbf16>, vector<128x128xbf16>, vector<128x128xf32> -> vector<128x128xf32>
    %7 = arith.addf %3, %6 : vector<128x128xf32>
    %c0_6 = arith.constant 0 : index
    %c0_7 = arith.constant 0 : index
    %8 = vector.load %arg5[%c0_6, %c0_7] : memref<128x128xf32, #tpu.memory_space<vmem>>, vector<128x128xf32>
    tpu.vector_store %arg5[%c0_6, %c0_7], %7 {strides = array<i32>} : memref<128x128xf32, #tpu.memory_space<vmem>>, vector<128x128xf32>,
    %c0_i32_8 = arith.constant 0 : i32
    %9 = arith.cmpi eq, %arg1, %c0_i32_8 : i32
    %10 = arith.extui %9 : i1 to i32
    %c0_i32_9 = arith.constant 0 : i32
    %11 = arith.cmpi ne, %10, %c0_i32_9 : i32
    scf.if %11 {
      %c0_10 = arith.constant 0 : index
      %c0_11 = arith.constant 0 : index
      %12 = vector.load %arg5[%c0_10, %c0_11] : memref<128x128xf32, #tpu.memory_space<vmem>>, vector<128x128xf32>
      %c0_12 = arith.constant 0 : index
      %c0_13 = arith.constant 0 : index
      %13 = vector.load %arg4[%c0_12, %c0_13] : memref<1x128xf32, #tpu.memory_space<vmem>>, vector<1x128xf32>
      %14 = vector.broadcast %13 : vector<1x128xf32> to vector<128x128xf32>
      %15 = arith.addf %12, %14 : vector<128x128xf32>
      %16 = tpu.iota {dimensions = array<i32: 1>} : vector<128x128xi32>
      %c16_i32 = arith.constant 16 : i32
      %17 = vector.broadcast %c16_i32 : i32 to vector<128x128xi32>
      %18 = arith.cmpi slt, %16, %17 : vector<128x128xi32>
      %cst_14 = arith.constant 0xFF800000 : f32
      %19 = vector.broadcast %cst_14 : f32 to vector<128x128xf32>
      %20 = arith.select %18, %15, %19 : vector<128x128xi1>, vector<128x128xf32>
      %cst_15 = arith.constant dense<0xFF800000> : vector<128xf32>
      %21 = vector.multi_reduction <maximumf>, %20, %cst_15 [1] : vector<128x128xf32> to vector<128xf32>
      %22 = vector.shape_cast %21 : vector<128xf32> to vector<128x1xf32>
      %23 = vector.broadcast %22 : vector<128x1xf32> to vector<128x128xf32>
      %24 = arith.subf %20, %23 : vector<128x128xf32>
      %25 = math.exp %24 : vector<128x128xf32>
      %cst_16 = arith.constant dense<0.000000e+00> : vector<128xf32>
      %26 = vector.multi_reduction <add>, %25, %cst_16 [1] : vector<128x128xf32> to vector<128xf32>
      %27 = vector.shape_cast %26 : vector<128xf32> to vector<128x1xf32>
      %28 = math.log %27 : vector<128x1xf32>
      %29 = vector.broadcast %28 : vector<128x1xf32> to vector<128x128xf32>
      %30 = arith.subf %24, %29 : vector<128x128xf32>
      %c0_17 = arith.constant 0 : index
      %c0_18 = arith.constant 0 : index
      %31 = vector.load %arg5[%c0_17, %c0_18] : memref<128x128xf32, #tpu.memory_space<vmem>>, vector<128x128xf32>
      tpu.vector_store %arg5[%c0_17, %c0_18], %30 {strides = array<i32>} : memref<128x128xf32, #tpu.memory_space<vmem>>, vector<128x128xf32>,
    } else {
    }
    return
  }
  func.func @transform_0(%arg0: i32, %arg1: i32) -> (i32, i32) {
    %c0_i32 = arith.constant 0 : i32
    return %arg0, %arg1 : i32, i32
  }
  func.func @transform_1(%arg0: i32, %arg1: i32) -> (i32, i32) {
    %c0_i32 = arith.constant 0 : i32
    %c0_i32_0 = arith.constant 0 : i32
    return %arg1, %c0_i32 : i32, i32
  }
  func.func @transform_2(%arg0: i32, %arg1: i32) -> (i32, i32) {
    %c0_i32 = arith.constant 0 : i32
    %c0_i32_0 = arith.constant 0 : i32
    %c0_i32_1 = arith.constant 0 : i32
    return %c0_i32, %c0_i32_0 : i32, i32
  }
  func.func @transform_3(%arg0: i32, %arg1: i32) -> (i32, i32) {
    %c0_i32 = arith.constant 0 : i32
    %c0_i32_0 = arith.constant 0 : i32
    return %arg0, %c0_i32 : i32, i32
  }
}

</mosaic_0001>

<bundles_post_ra>
// kernel: gcn_forward.3
= control target key start
LH: loop header
LB: loop body
LE: loop exit
PB: predicated region body
PF: predicated region fallthrough
CT: control target
= control target key end

     0   :  { %s670_s1 = inlined_call_operand.vmem [shape: bf16[128,128], index: 1, kind: input, shape index: {}]   ;;  %s671_s0 = inlined_call_operand.vmem [shape: bf16[128,128], index: 0, kind: input, shape index: {}]   ;;  %s672_s2 = inlined_call_operand.vmem [shape: bf16[128,128], index: 2, kind: output, shape index: {}]  }
   0x1   :  { %v567_v0 = vld [vmem:[%s670_s1 + $0x38] sm:$0xff]   ;;  %v568_v1 = vld [vmem:[%s670_s1 + $0x30] sm:$0xff]   ;;  %v569_v2 = vld [vmem:[%s670_s1 + $0x28] sm:$0xff]  }
   0x2   :  { %519 = vmatprep.subr.bf16.mxu0 %v567_v0  ;;  %551 = vmatprep.subr.bf16.mxu1 %v567_v0  ;;  %v570_v3 = vld [vmem:[%s670_s1 + $0x20] sm:$0xff]   ;;  %v571_v6 = vld [vmem:[%s670_s1 + $0x18] sm:$0xff]   ;;  %v572_v7 = vld [vmem:[%s670_s1 + $0x10] sm:$0xff]  }
   0x3   :  { %520 = vmatpush3.bf16.msra.mxu0 %v567_v0  ;;  %559 = vmatpush3.bf16.msra.mxu1 %v567_v0  ;;  %v575_v4 = vld [vmem:[%s671_s0] sm:$0xff]   ;;  %v573_v8 = vld [vmem:[%s670_s1 + $0x8] sm:$0xff]   ;;  %v579_v12 = vld [vmem:[%s671_s0 + $0x10] sm:$0xff]  }
   0x4   :  { %521 = vmatprep.subr.bf16.mxu0 %v568_v1  ;;  %552 = vmatprep.subr.bf16.mxu1 %v568_v1  ;;  %v576_v5 = vld [vmem:[%s671_s0 + $0x20] sm:$0xff]   ;;  %v577_v10 = vld [vmem:[%s671_s0 + $0x8] sm:$0xff]   ;;  %v580_v13 = vld [vmem:[%s671_s0 + $0x30] sm:$0xff]  }
   0x5   :  { %535 = vmatprep.mubr.bf16.mxu0 %v575_v4  ;;  %543 = vmatprep.mubr.bf16.mxu1 %v576_v5  ;;  %v574_v9 = vld [vmem:[%s670_s1] sm:$0xff]   ;;  %v578_v11 = vld [vmem:[%s671_s0 + $0x28] sm:$0xff]   ;;  %v581_v14 = vld [vmem:[%s671_s0 + $0x18] sm:$0xff]  }
   0x6   :  { %v582_v15 = vld [vmem:[%s671_s0 + $0x38] sm:$0xff]  }
   0x7   :  { %522 = vmatpush3.bf16.msra.mxu0 %v568_v1  ;;  %560 = vmatpush3.bf16.msra.mxu1 %v568_v1 }
   0x8   :  { %523 = vmatprep.subr.bf16.mxu0 %v569_v2  ;;  %553 = vmatprep.subr.bf16.mxu1 %v569_v2 }
   0xb   :  { %524 = vmatpush3.bf16.msra.mxu0 %v569_v2  ;;  %561 = vmatpush3.bf16.msra.mxu1 %v569_v2 }
   0xc   :  { %525 = vmatprep.subr.bf16.mxu0 %v570_v3  ;;  %554 = vmatprep.subr.bf16.mxu1 %v570_v3 }
   0xf   :  { %526 = vmatpush3.bf16.msra.mxu0 %v570_v3  ;;  %562 = vmatpush3.bf16.msra.mxu1 %v570_v3 }
  0x10   :  { %527 = vmatprep.subr.bf16.mxu0 %v571_v6  ;;  %555 = vmatprep.subr.bf16.mxu1 %v571_v6 }
  0x13   :  { %528 = vmatpush3.bf16.msra.mxu0 %v571_v6  ;;  %563 = vmatpush3.bf16.msra.mxu1 %v571_v6 }
  0x14   :  { %529 = vmatprep.subr.bf16.mxu0 %v572_v7  ;;  %556 = vmatprep.subr.bf16.mxu1 %v572_v7 }
  0x17   :  { %530 = vmatpush3.bf16.msra.mxu0 %v572_v7  ;;  %564 = vmatpush3.bf16.msra.mxu1 %v572_v7 }
  0x18   :  { %531 = vmatprep.subr.bf16.mxu0 %v573_v8  ;;  %557 = vmatprep.subr.bf16.mxu1 %v573_v8 }
  0x1b   :  { %532 = vmatpush3.bf16.msra.mxu0 %v573_v8  ;;  %565 = vmatpush3.bf16.msra.mxu1 %v573_v8 }
  0x1c   :  { %533 = vmatprep.subr.bf16.mxu0 %v574_v9  ;;  %558 = vmatprep.subr.bf16.mxu1 %v574_v9 }
  0x1f   :  { %534 = vmatpush3.bf16.msra.mxu0 %v574_v9  ;;  %566 = vmatpush3.bf16.msra.mxu1 %v574_v9 }
  0x22   :  { %536 = vmatmul.mubr.bf16.vlgmr.msra.gmra.mxu0 %v577_v10  ;;  %544 = vmatmul.mubr.bf16.vlgmr.msra.gmra.mxu1 %v578_v11 }
  0x23   :  { %539 = vmatprep.mubr.bf16.mxu0 %v579_v12  ;;  %547 = vmatprep.mubr.bf16.mxu1 %v580_v13 }
  0x2a   :  { %540 = vmatmul.mubr.bf16.gmra.mxu0 %v581_v14  ;;  %548 = vmatmul.mubr.bf16.gmra.mxu1 %v582_v15 }
  0xe2   :  { %v537_v16 = vpop.f32.mrf.mxu0  ;;  %v545_v17 = vpop.f32.mrf.mxu1 }
  0xe4   :  { %v210_v18 = vpop.f32.mrf.mxu0  ;;  %v242_v19 = vpop.f32.mrf.mxu1 }
  0xe6   :  { %v538_v20 = vpop.f32.mrf.mxu0  ;;  %v546_v21 = vpop.f32.mrf.mxu1 }
  0xe7   :  { %v464_v22 = vpack.c.bf16 %v538_v20, %v537_v16  ;;  %v484_v23 = vpack.c.bf16 %v546_v21, %v545_v17 }
  0xe8   :  { %v213_v24 = vpop.f32.mrf.mxu0  ;;  %v245_v25 = vpop.f32.mrf.mxu1 }
  0xe9   :  { %496 = vst [vmem:[%s672_s2 + $0x8] sm:$0xff] %v464_v22   ;;  %500 = vst [vmem:[%s672_s2 + $0x28] sm:$0xff] %v484_v23   ;;  %v459_v26 = vpack.c.bf16 %v213_v24, %v210_v18  ;;  %v479_v27 = vpack.c.bf16 %v245_v25, %v242_v19 }
  0xea   :  { %v541_v28 = vpop.f32.mrf.mxu0  ;;  %v549_v29 = vpop.f32.mrf.mxu1 }
  0xeb   :  { %460 = vst [vmem:[%s672_s2] sm:$0xff] %v459_v26   ;;  %499 = vst [vmem:[%s672_s2 + $0x20] sm:$0xff] %v479_v27  }
  0xec   :  { %v226_v30 = vpop.f32.mrf.mxu0  ;;  %v258_v31 = vpop.f32.mrf.mxu1 }
  0xee   :  { %v542_v32 = vpop.f32.mrf.mxu0  ;;  %v550_v33 = vpop.f32.mrf.mxu1 }
  0xef   :  { %v474_v34 = vpack.c.bf16 %v542_v32, %v541_v28  ;;  %v494_v35 = vpack.c.bf16 %v550_v33, %v549_v29 }
  0xf0   :  { %v229_v36 = vpop.f32.mrf.mxu0  ;;  %v261_v37 = vpop.f32.mrf.mxu1 }
  0xf1   :  { %498 = vst [vmem:[%s672_s2 + $0x18] sm:$0xff] %v474_v34   ;;  %502 = vst [vmem:[%s672_s2 + $0x38] sm:$0xff] %v494_v35   ;;  %v469_v38 = vpack.c.bf16 %v229_v36, %v226_v30  ;;  %v489_v39 = vpack.c.bf16 %v261_v37, %v258_v31 }
  0xf3   :  { %497 = vst [vmem:[%s672_s2 + $0x10] sm:$0xff] %v469_v38   ;;  %501 = vst [vmem:[%s672_s2 + $0x30] sm:$0xff] %v489_v39  }

// kernel: gcn_forward.5
= control target key start
LH: loop header
LB: loop body
LE: loop exit
PB: predicated region body
PF: predicated region fallthrough
CT: control target
= control target key end

     0   :  { %v350_v16 = vlaneseq  ;;  %s945_s1 = inlined_call_operand.vmem [shape: bf16[128,128], index: 1, kind: input, shape index: {}]   ;;  %s946_s0 = inlined_call_operand.vmem [shape: bf16[128,128], index: 0, kind: input, shape index: {}]   ;;  %s947_s2 = inlined_call_operand.vmem [shape: f32[1,128], index: 2, kind: input, shape index: {}]   ;;  %s948_s3 = inlined_call_operand.vmem [shape: f32[128,128], index: 3, kind: output, shape index: {}]  }
   0x1   :  { %v631_v0 = vld [vmem:[%s945_s1 + $0x38] sm:$0xff]   ;;  %v632_v1 = vld [vmem:[%s945_s1 + $0x30] sm:$0xff]   ;;  %v633_v2 = vld [vmem:[%s945_s1 + $0x28] sm:$0xff]  }
   0x2   :  { %582 = vmatprep.subr.bf16.mxu0 %v631_v0  ;;  %614 = vmatprep.subr.bf16.mxu1 %v631_v0  ;;  %v634_v3 = vld [vmem:[%s945_s1 + $0x20] sm:$0xff]   ;;  %v635_v6 = vld [vmem:[%s945_s1 + $0x18] sm:$0xff]   ;;  %v636_v7 = vld [vmem:[%s945_s1 + $0x10] sm:$0xff]   ;;  %v779_v17 = vand.u32 127, %v350_v16 }
   0x3   :  { %583 = vmatpush3.bf16.msra.mxu0 %v631_v0  ;;  %622 = vmatpush3.bf16.msra.mxu1 %v631_v0  ;;  %v639_v4 = vld [vmem:[%s946_s0] sm:$0xff]   ;;  %v637_v8 = vld [vmem:[%s945_s1 + $0x8] sm:$0xff]   ;;  %v643_v12 = vld [vmem:[%s946_s0 + $0x10] sm:$0xff]  }
   0x4   :  { %584 = vmatprep.subr.bf16.mxu0 %v632_v1  ;;  %615 = vmatprep.subr.bf16.mxu1 %v632_v1  ;;  %v640_v5 = vld [vmem:[%s946_s0 + $0x20] sm:$0xff]   ;;  %v641_v10 = vld [vmem:[%s946_s0 + $0x8] sm:$0xff]   ;;  %v645_v13 = vld [vmem:[%s946_s0 + $0x30] sm:$0xff]   ;;  %vm352_vm0 = vcmp.lt.s32.totalorder %v779_v17, 16 }
   0x5   :  { %598 = vmatprep.mubr.bf16.mxu0 %v639_v4  ;;  %606 = vmatprep.mubr.bf16.mxu1 %v640_v5  ;;  %v638_v9 = vld [vmem:[%s945_s1] sm:$0xff]   ;;  %v642_v11 = vld [vmem:[%s946_s0 + $0x28] sm:$0xff]   ;;  %v644_v14 = vld [vmem:[%s946_s0 + $0x18] sm:$0xff]  }
   0x6   :  { %v646_v15 = vld [vmem:[%s946_s0 + $0x38] sm:$0xff]   ;;  %v565_v20 = vld [vmem:[%s947_s2] ss:$0 sm:$0xff] }
   0x7   :  { %585 = vmatpush3.bf16.msra.mxu0 %v632_v1  ;;  %623 = vmatpush3.bf16.msra.mxu1 %v632_v1 }
   0x8   :  { %586 = vmatprep.subr.bf16.mxu0 %v633_v2  ;;  %616 = vmatprep.subr.bf16.mxu1 %v633_v2 }
   0xb   :  { %587 = vmatpush3.bf16.msra.mxu0 %v633_v2  ;;  %624 = vmatpush3.bf16.msra.mxu1 %v633_v2 }
   0xc   :  { %588 = vmatprep.subr.bf16.mxu0 %v634_v3  ;;  %617 = vmatprep.subr.bf16.mxu1 %v634_v3 }
   0xf   :  { %589 = vmatpush3.bf16.msra.mxu0 %v634_v3  ;;  %625 = vmatpush3.bf16.msra.mxu1 %v634_v3 }
  0x10   :  { %590 = vmatprep.subr.bf16.mxu0 %v635_v6  ;;  %618 = vmatprep.subr.bf16.mxu1 %v635_v6 }
  0x13   :  { %591 = vmatpush3.bf16.msra.mxu0 %v635_v6  ;;  %626 = vmatpush3.bf16.msra.mxu1 %v635_v6 }
  0x14   :  { %592 = vmatprep.subr.bf16.mxu0 %v636_v7  ;;  %619 = vmatprep.subr.bf16.mxu1 %v636_v7 }
  0x17   :  { %593 = vmatpush3.bf16.msra.mxu0 %v636_v7  ;;  %627 = vmatpush3.bf16.msra.mxu1 %v636_v7 }
  0x18   :  { %594 = vmatprep.subr.bf16.mxu0 %v637_v8  ;;  %620 = vmatprep.subr.bf16.mxu1 %v637_v8 }
  0x1b   :  { %595 = vmatpush3.bf16.msra.mxu0 %v637_v8  ;;  %628 = vmatpush3.bf16.msra.mxu1 %v637_v8 }
  0x1c   :  { %596 = vmatprep.subr.bf16.mxu0 %v638_v9  ;;  %621 = vmatprep.subr.bf16.mxu1 %v638_v9 }
  0x1f   :  { %597 = vmatpush3.bf16.msra.mxu0 %v638_v9  ;;  %629 = vmatpush3.bf16.msra.mxu1 %v638_v9 }
  0x22   :  { %599 = vmatmul.mubr.bf16.vlgmr.msra.gmra.mxu0 %v641_v10  ;;  %607 = vmatmul.mubr.bf16.vlgmr.msra.gmra.mxu1 %v642_v11 }
  0x23   :  { %602 = vmatprep.mubr.bf16.mxu0 %v643_v12  ;;  %610 = vmatprep.mubr.bf16.mxu1 %v645_v13 }
  0x2a   :  { %603 = vmatmul.mubr.bf16.gmra.mxu0 %v644_v14  ;;  %611 = vmatmul.mubr.bf16.gmra.mxu1 %v646_v15 }
  0xe2   :  { %v600_v18 = vpop.f32.mrf.mxu0  ;;  %v608_v19 = vpop.f32.mrf.mxu1 }
  0xe3   :  { %v344_v23 = vadd.f32 %v608_v19, %v565_v20  ;;  %v336_v24 = vadd.f32 %v600_v18, %v565_v20 }
  0xe4   :  { %v213_v21 = vpop.f32.mrf.mxu0  ;;  %v245_v22 = vpop.f32.mrf.mxu1 }
  0xe5   :  { %v363_v27 = vsel %vm352_vm0, %v344_v23, -inf  ;;  %v355_v28 = vsel %vm352_vm0, %v336_v24, -inf  ;;  %v334_v31 = vadd.f32 %v565_v20, %v213_v21  ;;  %v342_v35 = vadd.f32 %v565_v20, %v245_v22 }
  0xe6   :  { %v601_v25 = vpop.f32.mrf.mxu0  ;;  %v609_v26 = vpop.f32.mrf.mxu1  ;;  %389 = vmax.xlane.f32.xlu0 %v363_v27  ;;  %373 = vmax.xlane.f32.xlu1 %v355_v28 }
  0xe7   :  { %v337_v32 = vadd.f32 %v601_v25, %v565_v20  ;;  %v353_v36 = vsel %vm352_vm0, %v334_v31, -inf  ;;  %v345_v38 = vadd.f32 %v609_v26, %v565_v20  ;;  %v361_v42 = vsel %vm352_vm0, %v342_v35, -inf }
  0xe8   :  { %v216_v29 = vpop.f32.mrf.mxu0  ;;  %v248_v30 = vpop.f32.mrf.mxu1 }
  0xe9   :  { %v356_v37 = vsel %vm352_vm0, %v337_v32, -inf  ;;  %v364_v43 = vsel %vm352_vm0, %v345_v38, -inf  ;;  %v343_v44 = vadd.f32 %v565_v20, %v248_v30  ;;  %v335_v45 = vadd.f32 %v565_v20, %v216_v29 }
  0xea   :  { %v604_v33 = vpop.f32.mrf.mxu0  ;;  %v612_v34 = vpop.f32.mrf.mxu1  ;;  %369 = vmax.xlane.f32.xlu0 %v353_v36  ;;  %375 = vmax.xlane.f32.xlu1 %v356_v37 }
  0xeb   :  { %v340_v48 = vadd.f32 %v604_v33, %v565_v20  ;;  %v362_v50 = vsel %vm352_vm0, %v343_v44, -inf  ;;  %v354_v51 = vsel %vm352_vm0, %v335_v45, -inf  ;;  %v348_v63 = vadd.f32 %v612_v34, %v565_v20 }
  0xec   :  { %v229_v39 = vpop.f32.mrf.mxu0  ;;  %v261_v40 = vpop.f32.mrf.mxu1 }
  0xed   :  { %v359_v53 = vsel %vm352_vm0, %v340_v48, -inf  ;;  %v338_v55 = vadd.f32 %v565_v20, %v229_v39  ;;  %v346_v59 = vadd.f32 %v565_v20, %v261_v40  ;;  %v821_v1 = vsel %vm352_vm0, %v348_v63, -inf }
  0xee   :  { %v605_v41 = vpop.f32.mrf.mxu0  ;;  %v613_v47 = vpop.f32.mrf.mxu1  ;;  %385 = vmax.xlane.f32.xlu0 %v361_v42  ;;  %391 = vmax.xlane.f32.xlu1 %v364_v43 }
  0xef   :  { %v341_v49 = vadd.f32 %v605_v41, %v565_v20  ;;  %v357_v57 = vsel %vm352_vm0, %v338_v55, -inf  ;;  %v811_v61 = vsel %vm352_vm0, %v346_v59, -inf  ;;  %v349_v0 = vadd.f32 %v613_v47, %v565_v20 }
  0xf0   :  { %v232_v46 = vpop.f32.mrf.mxu0  ;;  %v264_v52 = vpop.f32.mrf.mxu1 }
  0xf1   :  { %v360_v54 = vsel %vm352_vm0, %v341_v49, -inf  ;;  %v339_v56 = vadd.f32 %v565_v20, %v232_v46  ;;  %v347_v60 = vadd.f32 %v565_v20, %v264_v52  ;;  %v825_v2 = vsel %vm352_vm0, %v349_v0, -inf }
  0xf2   :  { %387 = vmax.xlane.f32.xlu1 %v362_v50  ;;  %371 = vmax.xlane.f32.xlu0 %v354_v51 }
  0xf3   :  { %v358_v58 = vsel %vm352_vm0, %v339_v56, -inf  ;;  %v815_v62 = vsel %vm352_vm0, %v347_v60, -inf }
  0xf6   :  { %381 = vmax.xlane.f32.xlu0 %v359_v53  ;;  %383 = vmax.xlane.f32.xlu1 %v360_v54 }
  0xfa   :  { %377 = vmax.xlane.f32.xlu0 %v357_v57  ;;  %379 = vmax.xlane.f32.xlu1 %v358_v58 }
  0xfe   :  { %393 = vmax.xlane.f32.xlu0 %v811_v61  ;;  %395 = vmax.xlane.f32.xlu1 %v815_v62 }
 0x102   :  { %397 = vmax.xlane.f32.xlu0 %v821_v1  ;;  %399 = vmax.xlane.f32.xlu1 %v825_v2 }
 0x16f   :  { %v390_v3 = vpop.xlane.xlu0 %389  ;;  %v374_v4 = vpop.xlane.xlu1 %373 }
 0x170   :  { %v829_v5 = vsub.f32 %v363_v27, %v390_v3  ;;  %v831_v6 = vsub.f32 %v355_v28, %v374_v4 }
 0x172   :  { %v421_v7 = vmul.f32 1.442695, %v831_v6  ;;  %v437_v10 = vmul.f32 1.442695, %v829_v5 }
 0x173   :  { %v370_v8 = vpop.xlane.xlu0 %369  ;;  %v376_v9 = vpop.xlane.xlu1 %375 }
 0x174   :  { %v835_v11 = vsub.f32 %v353_v36, %v370_v8  ;;  %v837_v12 = vsub.f32 %v356_v37, %v376_v9  ;;  %647 = vpow2.f32 %v421_v7 }
 0x175   :  { %649 = vpow2.f32 %v437_v10 }
 0x176   :  { %v423_v13 = vmul.f32 1.442695, %v837_v12  ;;  %v417_v16 = vmul.f32 1.442695, %v835_v11 }
 0x177   :  { %v386_v14 = vpop.xlane.xlu0 %385  ;;  %v392_v15 = vpop.xlane.xlu1 %391 }
 0x178   :  { %v841_v17 = vsub.f32 %v361_v42, %v386_v14  ;;  %v843_v18 = vsub.f32 %v364_v43, %v392_v15  ;;  %651 = vpow2.f32 %v423_v13 }
 0x179   :  { %653 = vpow2.f32 %v417_v16 }
 0x17a   :  { %v439_v19 = vmul.f32 1.442695, %v843_v18  ;;  %v433_v22 = vmul.f32 1.442695, %v841_v17 }
 0x17b   :  { %v388_v20 = vpop.xlane.xlu1 %387  ;;  %v372_v21 = vpop.xlane.xlu0 %371 }
 0x17c   :  { %v847_v23 = vsub.f32 %v354_v51, %v372_v21  ;;  %655 = vpow2.f32 %v439_v19  ;;  %v849_v24 = vsub.f32 %v362_v50, %v388_v20 }
 0x17d   :  { %657 = vpow2.f32 %v433_v22 }
 0x17e   :  { %v419_v25 = vmul.f32 1.442695, %v847_v23  ;;  %v435_v29 = vmul.f32 1.442695, %v849_v24 }
 0x17f   :  { %v382_v26 = vpop.xlane.xlu0 %381  ;;  %v384_v27 = vpop.xlane.xlu1 %383 }
 0x180   :  { %v852_v28 = vsub.f32 %v359_v53, %v382_v26  ;;  %659 = vpow2.f32 %v419_v25  ;;  %v855_v30 = vsub.f32 %v360_v54, %v384_v27 }
 0x181   :  { %v648_v31 = vpop.eup %647 }
 0x182   :  { %v429_v32 = vmul.f32 1.442695, %v852_v28  ;;  %453 = vadd.xlane.f32.xlu0 %v648_v31  ;;  %v650_v36 = vpop.eup %649  ;;  %v431_v37 = vmul.f32 1.442695, %v855_v30 }
 0x183   :  { %v378_v33 = vpop.xlane.xlu0 %377  ;;  %v380_v34 = vpop.xlane.xlu1 %379 }
 0x184   :  { %661 = vpow2.f32 %v429_v32  ;;  %v858_v35 = vsub.f32 %v357_v57, %v378_v33  ;;  %v861_v38 = vsub.f32 %v358_v58, %v380_v34 }
 0x185   :  { %663 = vpow2.f32 %v435_v29  ;;  %v652_v39 = vpop.eup %651 }
 0x186   :  { %v425_v40 = vmul.f32 1.442695, %v858_v35  ;;  %469 = vadd.xlane.f32.xlu0 %v650_v36  ;;  %455 = vadd.xlane.f32.xlu1 %v652_v39  ;;  %v654_v44 = vpop.eup %653  ;;  %v427_v45 = vmul.f32 1.442695, %v861_v38 }
 0x187   :  { %v394_v41 = vpop.xlane.xlu0 %393  ;;  %v396_v42 = vpop.xlane.xlu1 %395 }
 0x188   :  { %665 = vpow2.f32 %v425_v40  ;;  %v865_v43 = vsub.f32 %v811_v61, %v394_v41  ;;  %v869_v46 = vsub.f32 %v815_v62, %v396_v42 }
 0x189   :  { %667 = vpow2.f32 %v431_v37  ;;  %v656_v47 = vpop.eup %655 }
 0x18a   :  { %v441_v48 = vmul.f32 1.442695, %v865_v43  ;;  %449 = vadd.xlane.f32.xlu0 %v654_v44  ;;  %471 = vadd.xlane.f32.xlu1 %v656_v47  ;;  %v658_v52 = vpop.eup %657  ;;  %v443_v53 = vmul.f32 1.442695, %v869_v46 }
 0x18b   :  { %v398_v49 = vpop.xlane.xlu0 %397  ;;  %v400_v50 = vpop.xlane.xlu1 %399 }
 0x18c   :  { %669 = vpow2.f32 %v441_v48  ;;  %v873_v51 = vsub.f32 %v821_v1, %v398_v49  ;;  %v877_v54 = vsub.f32 %v825_v2, %v400_v50 }
 0x18d   :  { %671 = vpow2.f32 %v427_v45  ;;  %v660_v55 = vpop.eup %659 }
 0x18e   :  { %v445_v56 = vmul.f32 1.442695, %v873_v51  ;;  %465 = vadd.xlane.f32.xlu0 %v658_v52  ;;  %451 = vadd.xlane.f32.xlu1 %v660_v55  ;;  %v447_v58 = vmul.f32 1.442695, %v877_v54 }
 0x190   :  { %673 = vpow2.f32 %v445_v56 }
 0x191   :  { %v662_v57 = vpop.eup %661  ;;  %675 = vpow2.f32 %v443_v53 }
 0x192   :  { %v664_v59 = vpop.eup %663  ;;  %461 = vadd.xlane.f32.xlu0 %v662_v57  ;;  %677 = vpow2.f32 %v447_v58 }
 0x193   :  { %467 = vadd.xlane.f32.xlu1 %v664_v59 }
 0x195   :  { %v666_v60 = vpop.eup %665 }
 0x196   :  { %v668_v61 = vpop.eup %667  ;;  %457 = vadd.xlane.f32.xlu0 %v666_v60 }
 0x197   :  { %463 = vadd.xlane.f32.xlu1 %v668_v61 }
 0x199   :  { %v670_v62 = vpop.eup %669 }
 0x19a   :  { %v672_v63 = vpop.eup %671  ;;  %473 = vadd.xlane.f32.xlu0 %v670_v62 }
 0x19b   :  { %459 = vadd.xlane.f32.xlu1 %v672_v63 }
 0x19d   :  { %v674_v0 = vpop.eup %673 }
 0x19e   :  { %v676_v1 = vpop.eup %675  ;;  %477 = vadd.xlane.f32.xlu0 %v674_v0 }
 0x19f   :  { %475 = vadd.xlane.f32.xlu1 %v676_v1  ;;  %v678_v2 = vpop.eup %677 }
 0x1a3   :  { %479 = vadd.xlane.f32.xlu1 %v678_v2 }
 0x20b   :  { %v454_v3 = vpop.xlane.xlu0 %453 }
 0x20c   :  { %679 = vlog2.f32 %v454_v3 }
 0x20f   :  { %v470_v4 = vpop.xlane.xlu0 %469  ;;  %v456_v7 = vpop.xlane.xlu1 %455 }
 0x210   :  { %681 = vlog2.f32 %v470_v4 }
 0x211   :  { %683 = vlog2.f32 %v456_v7 }
 0x213   :  { %v450_v8 = vpop.xlane.xlu0 %449  ;;  %v472_v9 = vpop.xlane.xlu1 %471 }
 0x214   :  { %685 = vlog2.f32 %v450_v8 }
 0x215   :  { %687 = vlog2.f32 %v472_v9 }
 0x217   :  { %v466_v10 = vpop.xlane.xlu0 %465  ;;  %v452_v13 = vpop.xlane.xlu1 %451 }
 0x218   :  { %689 = vlog2.f32 %v466_v10 }
 0x219   :  { %v680_v14 = vpop.eup %679  ;;  %691 = vlog2.f32 %v452_v13 }
 0x21a   :  { %v486_v15 = vmul.f32 0.6931472, %v680_v14 }
 0x21b   :  { %v462_v16 = vpop.xlane.xlu0 %461 }
 0x21c   :  { %v468_v19 = vpop.xlane.xlu1 %467  ;;  %v515_v20 = vsub.f32 %v831_v6, %v486_v15  ;;  %693 = vlog2.f32 %v462_v16 }
 0x21d   :  { %v682_v21 = vpop.eup %681  ;;  %695 = vlog2.f32 %v468_v19 }
 0x21e   :  { %v684_v22 = vpop.eup %683  ;;  %531 = vst [vmem:[%s948_s3 + $0x10] sm:$0xff] %v515_v20  ;;  %v502_v25 = vmul.f32 0.6931472, %v682_v21 }
 0x21f   :  { %v488_v26 = vmul.f32 0.6931472, %v684_v22  ;;  %v458_v27 = vpop.xlane.xlu0 %457 }
 0x220   :  { %v464_v29 = vpop.xlane.xlu1 %463  ;;  %v523_v31 = vsub.f32 %v829_v5, %v502_v25  ;;  %697 = vlog2.f32 %v458_v27 }
 0x221   :  { %v686_v32 = vpop.eup %685  ;;  %v516_v33 = vsub.f32 %v837_v12, %v488_v26  ;;  %699 = vlog2.f32 %v464_v29 }
 0x222   :  { %v688_v6 = vpop.eup %687  ;;  %539 = vst [vmem:[%s948_s3 + $0x50] sm:$0xff] %v523_v31  ;;  %v482_v34 = vmul.f32 0.6931472, %v686_v32 }
 0x223   :  { %532 = vst [vmem:[%s948_s3 + $0x18] sm:$0xff] %v516_v33  ;;  %v504_v36 = vmul.f32 0.6931472, %v688_v6  ;;  %v474_v37 = vpop.xlane.xlu0 %473 }
 0x224   :  { %v460_v39 = vpop.xlane.xlu1 %459  ;;  %v513_v5 = vsub.f32 %v835_v11, %v482_v34  ;;  %701 = vlog2.f32 %v474_v37 }
 0x225   :  { %v690_v40 = vpop.eup %689  ;;  %v524_v12 = vsub.f32 %v843_v18, %v504_v36  ;;  %703 = vlog2.f32 %v460_v39 }
 0x226   :  { %v692_v41 = vpop.eup %691  ;;  %529 = vst [vmem:[%s948_s3] sm:$0xff] %v513_v5  ;;  %v498_v42 = vmul.f32 0.6931472, %v690_v40 }
 0x227   :  { %540 = vst [vmem:[%s948_s3 + $0x58] sm:$0xff] %v524_v12  ;;  %v484_v44 = vmul.f32 0.6931472, %v692_v41  ;;  %v478_v45 = vpop.xlane.xlu0 %477 }
 0x228   :  { %v476_v47 = vpop.xlane.xlu1 %475  ;;  %v521_v11 = vsub.f32 %v841_v17, %v498_v42  ;;  %705 = vlog2.f32 %v478_v45 }
 0x229   :  { %v694_v48 = vpop.eup %693  ;;  %v514_v18 = vsub.f32 %v847_v23, %v484_v44  ;;  %707 = vlog2.f32 %v476_v47 }
 0x22a   :  { %v696_v49 = vpop.eup %695  ;;  %537 = vst [vmem:[%s948_s3 + $0x40] sm:$0xff] %v521_v11  ;;  %v494_v50 = vmul.f32 0.6931472, %v694_v48 }
 0x22b   :  { %530 = vst [vmem:[%s948_s3 + $0x8] sm:$0xff] %v514_v18  ;;  %v500_v52 = vmul.f32 0.6931472, %v696_v49 }
 0x22c   :  { %v480_v53 = vpop.xlane.xlu1 %479  ;;  %v519_v55 = vsub.f32 %v852_v28, %v494_v50 }
 0x22d   :  { %709 = vlog2.f32 %v480_v53  ;;  %v698_v17 = vpop.eup %697  ;;  %v522_v56 = vsub.f32 %v849_v24, %v500_v52 }
 0x22e   :  { %v700_v23 = vpop.eup %699  ;;  %535 = vst [vmem:[%s948_s3 + $0x30] sm:$0xff] %v519_v55  ;;  %v490_v57 = vmul.f32 0.6931472, %v698_v17 }
 0x22f   :  { %538 = vst [vmem:[%s948_s3 + $0x48] sm:$0xff] %v522_v56  ;;  %v496_v58 = vmul.f32 0.6931472, %v700_v23 }
 0x230   :  { %v517_v59 = vsub.f32 %v858_v35, %v490_v57 }
 0x231   :  { %v702_v60 = vpop.eup %701  ;;  %v520_v28 = vsub.f32 %v855_v30, %v496_v58 }
 0x232   :  { %v704_v61 = vpop.eup %703  ;;  %533 = vst [vmem:[%s948_s3 + $0x20] sm:$0xff] %v517_v59  ;;  %v506_v24 = vmul.f32 0.6931472, %v702_v60 }
 0x233   :  { %536 = vst [vmem:[%s948_s3 + $0x38] sm:$0xff] %v520_v28  ;;  %v492_v62 = vmul.f32 0.6931472, %v704_v61 }
 0x234   :  { %v525_v63 = vsub.f32 %v865_v43, %v506_v24 }
 0x235   :  { %v706_v0 = vpop.eup %705  ;;  %v518_v1 = vsub.f32 %v861_v38, %v492_v62 }
 0x236   :  { %v708_v35 = vpop.eup %707  ;;  %541 = vst [vmem:[%s948_s3 + $0x60] sm:$0xff] %v525_v63  ;;  %v510_v30 = vmul.f32 0.6931472, %v706_v0 }
 0x237   :  { %534 = vst [vmem:[%s948_s3 + $0x28] sm:$0xff] %v518_v1  ;;  %v508_v2 = vmul.f32 0.6931472, %v708_v35 }
 0x238   :  { %v527_v3 = vsub.f32 %v873_v51, %v510_v30 }
 0x239   :  { %v526_v7 = vsub.f32 %v869_v46, %v508_v2 }
 0x23a   :  { %v710_v4 = vpop.eup %709  ;;  %543 = vst [vmem:[%s948_s3 + $0x70] sm:$0xff] %v527_v3 }
 0x23b   :  { %v512_v38 = vmul.f32 0.6931472, %v710_v4  ;;  %542 = vst [vmem:[%s948_s3 + $0x68] sm:$0xff] %v526_v7 }
 0x23d   :  { %v528_v43 = vsub.f32 %v877_v54, %v512_v38 }
 0x23f   :  { %544 = vst [vmem:[%s948_s3 + $0x78] sm:$0xff] %v528_v43 }

// kernel: gcn_forward.4
= control target key start
LH: loop header
LB: loop body
LE: loop exit
PB: predicated region body
PF: predicated region fallthrough
CT: control target
= control target key end

     0   :  { %s970_s1 = inlined_call_operand.vmem [shape: bf16[128,128], index: 1, kind: input, shape index: {}]   ;;  %s971_s0 = inlined_call_operand.vmem [shape: bf16[128,128], index: 0, kind: input, shape index: {}]   ;;  %s972_s3 = inlined_call_operand.vmem [shape: bf16[128,128], index: 3, kind: input, shape index: {}]   ;;  %s973_s2 = inlined_call_operand.vmem [shape: f32[1,128], index: 2, kind: input, shape index: {}]   ;;  %s974_s4 = inlined_call_operand.vmem [shape: bf16[128,128], index: 4, kind: output, shape index: {}]  }
   0x1   :  { %v822_v0 = vld [vmem:[%s970_s1 + $0x38] sm:$0xff]   ;;  %v823_v1 = vld [vmem:[%s970_s1 + $0x30] sm:$0xff]   ;;  %v824_v2 = vld [vmem:[%s970_s1 + $0x28] sm:$0xff]  }
   0x2   :  { %758 = vmatprep.subr.bf16.mxu0 %v822_v0  ;;  %v825_v3 = vld [vmem:[%s970_s1 + $0x20] sm:$0xff]   ;;  %v826_v5 = vld [vmem:[%s970_s1 + $0x18] sm:$0xff]   ;;  %v827_v6 = vld [vmem:[%s970_s1 + $0x10] sm:$0xff]  }
   0x3   :  { %759 = vmatpush3.bf16.msra.mxu0 %v822_v0  ;;  %v830_v4 = vld [vmem:[%s971_s0] sm:$0xff]   ;;  %v838_v7 = vld [vmem:[%s972_s3 + $0x38] sm:$0xff]   ;;  %v839_v8 = vld [vmem:[%s972_s3 + $0x30] sm:$0xff]  }
   0x4   :  { %760 = vmatprep.subr.bf16.mxu0 %v823_v1  ;;  %774 = vmatprep.mubr.bf16.mxu0 %v830_v4  ;;  %v828_v9 = vld [vmem:[%s970_s1 + $0x8] sm:$0xff]   ;;  %v829_v11 = vld [vmem:[%s970_s1] sm:$0xff]   ;;  %v842_v13 = vld [vmem:[%s972_s3 + $0x18] sm:$0xff]  }
   0x5   :  { %790 = vmatprep.subr.bf16.mxu1 %v838_v7  ;;  %v840_v10 = vld [vmem:[%s972_s3 + $0x28] sm:$0xff]   ;;  %v841_v12 = vld [vmem:[%s972_s3 + $0x20] sm:$0xff]   ;;  %v832_v15 = vld [vmem:[%s971_s0 + $0x10] sm:$0xff]  }
   0x6   :  { %791 = vmatpush3.bf16.msra.mxu1 %v838_v7  ;;  %v831_v14 = vld [vmem:[%s971_s0 + $0x8] sm:$0xff]   ;;  %v833_v16 = vld [vmem:[%s971_s0 + $0x18] sm:$0xff]   ;;  %v834_v17 = vld [vmem:[%s971_s0 + $0x20] sm:$0xff]  }
   0x7   :  { %761 = vmatpush3.bf16.msra.mxu0 %v823_v1  ;;  %792 = vmatprep.subr.bf16.mxu1 %v839_v8  ;;  %v835_v18 = vld [vmem:[%s971_s0 + $0x28] sm:$0xff]   ;;  %v836_v19 = vld [vmem:[%s971_s0 + $0x30] sm:$0xff]   ;;  %v837_v20 = vld [vmem:[%s971_s0 + $0x38] sm:$0xff]  }
   0x8   :  { %762 = vmatprep.subr.bf16.mxu0 %v824_v2  ;;  %v843_v21 = vld [vmem:[%s972_s3 + $0x10] sm:$0xff]   ;;  %v844_v22 = vld [vmem:[%s972_s3 + $0x8] sm:$0xff]   ;;  %v845_v23 = vld [vmem:[%s972_s3] sm:$0xff]  }
   0x9   :  { %v638_v26 = vld [vmem:[%s973_s2] ss:$0 sm:$0xff] }
   0xa   :  { %793 = vmatpush3.bf16.msra.mxu1 %v839_v8 }
   0xb   :  { %763 = vmatpush3.bf16.msra.mxu0 %v824_v2  ;;  %794 = vmatprep.subr.bf16.mxu1 %v840_v10 }
   0xc   :  { %764 = vmatprep.subr.bf16.mxu0 %v825_v3 }
   0xe   :  { %795 = vmatpush3.bf16.msra.mxu1 %v840_v10 }
   0xf   :  { %765 = vmatpush3.bf16.msra.mxu0 %v825_v3  ;;  %796 = vmatprep.subr.bf16.mxu1 %v841_v12 }
  0x10   :  { %766 = vmatprep.subr.bf16.mxu0 %v826_v5 }
  0x12   :  { %797 = vmatpush3.bf16.msra.mxu1 %v841_v12 }
  0x13   :  { %767 = vmatpush3.bf16.msra.mxu0 %v826_v5  ;;  %798 = vmatprep.subr.bf16.mxu1 %v842_v13 }
  0x14   :  { %768 = vmatprep.subr.bf16.mxu0 %v827_v6 }
  0x16   :  { %799 = vmatpush3.bf16.msra.mxu1 %v842_v13 }
  0x17   :  { %769 = vmatpush3.bf16.msra.mxu0 %v827_v6  ;;  %800 = vmatprep.subr.bf16.mxu1 %v843_v21 }
  0x18   :  { %770 = vmatprep.subr.bf16.mxu0 %v828_v9 }
  0x1a   :  { %801 = vmatpush3.bf16.msra.mxu1 %v843_v21 }
  0x1b   :  { %771 = vmatpush3.bf16.msra.mxu0 %v828_v9  ;;  %802 = vmatprep.subr.bf16.mxu1 %v844_v22 }
  0x1c   :  { %772 = vmatprep.subr.bf16.mxu0 %v829_v11 }
  0x1e   :  { %803 = vmatpush3.bf16.msra.mxu1 %v844_v22 }
  0x1f   :  { %773 = vmatpush3.bf16.msra.mxu0 %v829_v11  ;;  %804 = vmatprep.subr.bf16.mxu1 %v845_v23 }
  0x22   :  { %775 = vmatmul.mubr.bf16.vlgmr.msra.gmra.mxu0 %v831_v14  ;;  %805 = vmatpush3.bf16.msra.mxu1 %v845_v23 }
  0x23   :  { %778 = vmatprep.mubr.bf16.mxu0 %v832_v15 }
  0x2a   :  { %779 = vmatmul.mubr.bf16.gmra.mxu0 %v833_v16 }
  0x2b   :  { %782 = vmatprep.mubr.bf16.mxu0 %v834_v17 }
  0x32   :  { %783 = vmatmul.mubr.bf16.gmra.mxu0 %v835_v18 }
  0x33   :  { %786 = vmatprep.mubr.bf16.mxu0 %v836_v19 }
  0x3a   :  { %787 = vmatmul.mubr.bf16.gmra.mxu0 %v837_v20 }
  0xe2   :  { %v776_v24 = vpop.f32.mrf.mxu0 }
  0xe3   :  { %v339_v30 = vadd.f32 %v776_v24, %v638_v26 }
  0xe4   :  { %v216_v25 = vpop.f32.mrf.mxu0 }
  0xe5   :  { %v337_v28 = vadd.f32 %v638_v26, %v216_v25  ;;  %v355_v37 = vmax.f32 %v339_v30, 0.0 }
  0xe6   :  { %v777_v27 = vpop.f32.mrf.mxu0 }
  0xe7   :  { %v340_v29 = vadd.f32 %v777_v27, %v638_v26  ;;  %v353_v35 = vmax.f32 %v337_v28, 0.0 }
  0xe8   :  { %v219_v31 = vpop.f32.mrf.mxu0 }
  0xe9   :  { %v338_v32 = vadd.f32 %v638_v26, %v219_v31  ;;  %v356_v33 = vmax.f32 %v340_v29, 0.0 }
  0xea   :  { %v780_v34 = vpop.f32.mrf.mxu0 }
  0xeb   :  { %v354_v36 = vmax.f32 %v338_v32, 0.0  ;;  %v370_v40 = vpack.c.bf16 %v356_v33, %v355_v37  ;;  %v343_v44 = vadd.f32 %v780_v34, %v638_v26 }
  0xec   :  { %v232_v38 = vpop.f32.mrf.mxu0 }
  0xed   :  { %v369_v39 = vpack.c.bf16 %v354_v36, %v353_v35  ;;  %v341_v42 = vadd.f32 %v638_v26, %v232_v38  ;;  %v359_v51 = vmax.f32 %v343_v44, 0.0 }
  0xee   :  { %v781_v41 = vpop.f32.mrf.mxu0 }
  0xef   :  { %v344_v43 = vadd.f32 %v781_v41, %v638_v26  ;;  %806 = vmatprep.mubr.bf16.mxu1 %v369_v39  ;;  %v357_v49 = vmax.f32 %v341_v42, 0.0 }
  0xf0   :  { %v235_v45 = vpop.f32.mrf.mxu0  ;;  %807 = vmatmul.mubr.bf16.vlgmr.msra.gmra.mxu1 %v370_v40 }
  0xf1   :  { %v342_v46 = vadd.f32 %v638_v26, %v235_v45  ;;  %v360_v47 = vmax.f32 %v344_v43, 0.0 }
  0xf2   :  { %v784_v48 = vpop.f32.mrf.mxu0 }
  0xf3   :  { %v358_v50 = vmax.f32 %v342_v46, 0.0  ;;  %v372_v54 = vpack.c.bf16 %v360_v47, %v359_v51  ;;  %v347_v58 = vadd.f32 %v784_v48, %v638_v26 }
  0xf4   :  { %v248_v52 = vpop.f32.mrf.mxu0 }
  0xf5   :  { %v371_v53 = vpack.c.bf16 %v358_v50, %v357_v49  ;;  %v345_v56 = vadd.f32 %v638_v26, %v248_v52  ;;  %v363_v1 = vmax.f32 %v347_v58, 0.0 }
  0xf6   :  { %v785_v55 = vpop.f32.mrf.mxu0 }
  0xf7   :  { %v348_v57 = vadd.f32 %v785_v55, %v638_v26  ;;  %810 = vmatprep.mubr.bf16.mxu1 %v371_v53  ;;  %v361_v63 = vmax.f32 %v345_v56, 0.0 }
  0xf8   :  { %v251_v59 = vpop.f32.mrf.mxu0  ;;  %811 = vmatmul.mubr.bf16.gmra.mxu1 %v372_v54 }
  0xf9   :  { %v346_v60 = vadd.f32 %v638_v26, %v251_v59  ;;  %v364_v61 = vmax.f32 %v348_v57, 0.0 }
  0xfa   :  { %v788_v62 = vpop.f32.mrf.mxu0 }
  0xfb   :  { %v362_v0 = vmax.f32 %v346_v60, 0.0  ;;  %v374_v4 = vpack.c.bf16 %v364_v61, %v363_v1  ;;  %v351_v8 = vadd.f32 %v788_v62, %v638_v26 }
  0xfc   :  { %v264_v2 = vpop.f32.mrf.mxu0 }
  0xfd   :  { %v373_v3 = vpack.c.bf16 %v362_v0, %v361_v63  ;;  %v349_v6 = vadd.f32 %v638_v26, %v264_v2  ;;  %v367_v14 = vmax.f32 %v351_v8, 0.0 }
  0xfe   :  { %v789_v5 = vpop.f32.mrf.mxu0 }
  0xff   :  { %v352_v7 = vadd.f32 %v789_v5, %v638_v26  ;;  %814 = vmatprep.mubr.bf16.mxu1 %v373_v3  ;;  %v365_v12 = vmax.f32 %v349_v6, 0.0 }
 0x100   :  { %v267_v9 = vpop.f32.mrf.mxu0  ;;  %815 = vmatmul.mubr.bf16.gmra.mxu1 %v374_v4 }
 0x101   :  { %v350_v10 = vadd.f32 %v638_v26, %v267_v9  ;;  %v368_v11 = vmax.f32 %v352_v7, 0.0 }
 0x103   :  { %v366_v13 = vmax.f32 %v350_v10, 0.0  ;;  %v376_v16 = vpack.c.bf16 %v368_v11, %v367_v14 }
 0x105   :  { %v375_v15 = vpack.c.bf16 %v366_v13, %v365_v12 }
 0x107   :  { %818 = vmatprep.mubr.bf16.mxu1 %v375_v15 }
 0x108   :  { %819 = vmatmul.mubr.bf16.gmra.mxu1 %v376_v16 }
 0x1b0   :  { %v808_v17 = vpop.f32.mrf.mxu1 }
 0x1b2   :  { %v475_v18 = vpop.f32.mrf.mxu1 }
 0x1b4   :  { %v809_v19 = vpop.f32.mrf.mxu1 }
 0x1b5   :  { %v687_v20 = vpack.c.bf16 %v809_v19, %v808_v17 }
 0x1b6   :  { %v478_v21 = vpop.f32.mrf.mxu1 }
 0x1b7   :  { %719 = vst [vmem:[%s974_s4 + $0x8] sm:$0xff] %v687_v20   ;;  %v682_v22 = vpack.c.bf16 %v478_v21, %v475_v18 }
 0x1b8   :  { %v812_v23 = vpop.f32.mrf.mxu1 }
 0x1b9   :  { %683 = vst [vmem:[%s974_s4] sm:$0xff] %v682_v22  }
 0x1ba   :  { %v491_v24 = vpop.f32.mrf.mxu1 }
 0x1bc   :  { %v813_v25 = vpop.f32.mrf.mxu1 }
 0x1bd   :  { %v697_v26 = vpack.c.bf16 %v813_v25, %v812_v23 }
 0x1be   :  { %v494_v27 = vpop.f32.mrf.mxu1 }
 0x1bf   :  { %721 = vst [vmem:[%s974_s4 + $0x18] sm:$0xff] %v697_v26   ;;  %v692_v28 = vpack.c.bf16 %v494_v27, %v491_v24 }
 0x1c0   :  { %v816_v29 = vpop.f32.mrf.mxu1 }
 0x1c1   :  { %720 = vst [vmem:[%s974_s4 + $0x10] sm:$0xff] %v692_v28  }
 0x1c2   :  { %v507_v30 = vpop.f32.mrf.mxu1 }
 0x1c4   :  { %v817_v31 = vpop.f32.mrf.mxu1 }
 0x1c5   :  { %v707_v32 = vpack.c.bf16 %v817_v31, %v816_v29 }
 0x1c6   :  { %v510_v33 = vpop.f32.mrf.mxu1 }
 0x1c7   :  { %723 = vst [vmem:[%s974_s4 + $0x28] sm:$0xff] %v707_v32   ;;  %v702_v34 = vpack.c.bf16 %v510_v33, %v507_v30 }
 0x1c8   :  { %v820_v35 = vpop.f32.mrf.mxu1 }
 0x1c9   :  { %722 = vst [vmem:[%s974_s4 + $0x20] sm:$0xff] %v702_v34  }
 0x1ca   :  { %v523_v36 = vpop.f32.mrf.mxu1 }
 0x1cc   :  { %v821_v37 = vpop.f32.mrf.mxu1 }
 0x1cd   :  { %v717_v38 = vpack.c.bf16 %v821_v37, %v820_v35 }
 0x1ce   :  { %v526_v39 = vpop.f32.mrf.mxu1 }
 0x1cf   :  { %725 = vst [vmem:[%s974_s4 + $0x38] sm:$0xff] %v717_v38   ;;  %v712_v40 = vpack.c.bf16 %v526_v39, %v523_v36 }
 0x1d1   :  { %724 = vst [vmem:[%s974_s4 + $0x30] sm:$0xff] %v712_v40  }

</bundles_post_ra>
